<compile_context>
chip_gen: v5e
topology: v5e:2x2
jax: 0.10.0
libtpu: 0.0.40
codegen_flags: <defaults>
</compile_context>

<pallas_src>
import math

import jax
import jax.numpy as jnp
from jax.experimental import pallas as pl
from jax.experimental.pallas import tpu as pltpu


# Adjacency sweep tile.  1024x1024 int8 = 1 MiB per tile (2 MiB double-buffered),
# comfortably inside the scoped-VMEM budget on v5e (16 MiB default), v6e (32 MiB)
# and v7x (32 MiB scoped / 64 MiB physical).
_TILE = 1024
_MIN_ALIGN = 256   # lane/sublane-friendly padding granule for small N


def _round_up(v, m):
    return ((v + m - 1) // m) * m


# ----------------------------- Pallas kernels ------------------------------ #

def _score_kernel(xw_ref, at_ref, xr_ref, score_ref, acc_ref):
    """score[0, i] = tanh( sum_j xw[j, 0] * At[j, i] + xr[0, i] )  (lane-dense row).

    VPU formulation of the M=1 mat-vec: broadcast-multiply the int8 adjacency
    tile (upcast in-register, hides under the tile DMA) against the xw column
    chunk and reduce over the sublane (source-node) axis.  No MXU weight-load
    serialization and no materialized f32 copy of the tile.

    Grid = (N/tn, N/tk): axis 0 tiles the output columns ("parallel"),
    axis 1 tiles the contraction over source nodes ("arbitrary", kept last).
    """
    k = pl.program_id(1)

    @pl.when(k == 0)
    def _init():
        acc_ref[...] = jnp.zeros_like(acc_ref)

    contrib = at_ref[...].astype(jnp.float32) * xw_ref[...]        # (tk, tn) VPU
    acc_ref[...] += jnp.sum(contrib, axis=0, keepdims=True)        # (1, tn)

    @pl.when(k == pl.num_programs(1) - 1)
    def _finalize():
        score_ref[...] = jnp.tanh(acc_ref[...] + xr_ref[...])


def _gather_scale_kernel(perm_ref, ssel_ref, x_ref, xu_ref, xcg_ref):
    """Row gather (no one-hot matmul), 8 rows per iteration:
         xu[i, :]  = x[perm[i], :]
         xcg[i, :] = x[perm[i], :] * score[perm[i]]
       perm and the selected scores live in SMEM (scalar prefetch); x rows are
       loaded with dynamic sublane slices and staged into an (8, F) register
       tile so each store is a full, unmasked sublane tile.
    """
    k_pad, f = xu_ref.shape
    n_groups = k_pad // 8
    row_id = jax.lax.broadcasted_iota(jnp.int32, (8, 1), 0)   # hoisted (no per-iter bcast)

    def body(g, carry):
        base = pl.multiple_of(g * 8, 8)
        tile = jnp.zeros((8, f), jnp.float32)
        tile_s = jnp.zeros((8, f), jnp.float32)
        for r in range(8):                                # static unroll within a group
            p = perm_ref[base + r]                        # dynamic scalar from SMEM
            row = x_ref[pl.ds(p, 1), :]                   # (1, F) dynamic-row load
            s = ssel_ref[base + r]                        # selected tanh(score) scalar
            sel = row_id == r
            tile = jnp.where(sel, row, tile)
            tile_s = jnp.where(sel, row * s, tile_s)
        xu_ref[pl.ds(base, 8), :] = tile                  # one unmasked store / 8 rows
        xcg_ref[pl.ds(base, 8), :] = tile_s
        return carry

    if n_groups <= 8:
        unroll = n_groups
    elif n_groups % 4 == 0:
        unroll = 4
    else:
        unroll = 1
    jax.lax.fori_loop(0, n_groups, body, 0, unroll=unroll)


# ------------------------------ wrappers ----------------------------------- #

def _sag_score_row(xw_col, at_i8, xr_row):
    """tanh(xw^T @ At + xr) as a tiled Pallas sweep over the int8 adjacency."""
    n_pad = at_i8.shape[0]
    t = min(_TILE, n_pad)          # n_pad is always a multiple of t (padded in caller)
    return pl.pallas_call(
        _score_kernel,
        out_shape=jax.ShapeDtypeStruct((1, n_pad), jnp.float32),
        grid_spec=pltpu.PrefetchScalarGridSpec(
            num_scalar_prefetch=0,
            grid=(n_pad // t, n_pad // t),                    # reduction axis last
            in_specs=[
                pl.BlockSpec((t, 1), lambda i, k: (k, 0)),    # xw column chunk (f32)
                pl.BlockSpec((t, t), lambda i, k: (k, i)),    # adjacency tile (int8)
                pl.BlockSpec((1, t), lambda i, k: (0, i)),    # root-term chunk (f32)
            ],
            out_specs=pl.BlockSpec((1, t), lambda i, k: (0, i)),
            scratch_shapes=[pltpu.VMEM((1, t), jnp.float32)],
        ),
        compiler_params=pltpu.CompilerParams(
            dimension_semantics=("parallel", "arbitrary"),
            vmem_limit_bytes=32 * 1024 * 1024,   # explicit for v5e's 16 MiB default
        ),
    )(xw_col, at_i8, xr_row)


def _gather_scale(perm_pad, ssel_pad, x):
    """x[perm] and x[perm] * score[perm] via an SMEM-driven row gather."""
    k_pad = perm_pad.shape[0]
    n, f = x.shape
    # TODO(synk): for large N*F keep x HBM-resident (memory_space=pl.ANY), tile the
    # grid over K blocks and double-buffer per-row DMAs driven by the SMEM perm
    # instead of holding the full feature matrix in VMEM (v7x 64 MiB VMEM hazard).
    return pl.pallas_call(
        _gather_scale_kernel,
        out_shape=(
            jax.ShapeDtypeStruct((k_pad, f), jnp.float32),
            jax.ShapeDtypeStruct((k_pad, f), jnp.float32),
        ),
        grid_spec=pltpu.PrefetchScalarGridSpec(
            num_scalar_prefetch=2,                            # perm + scores -> SMEM
            grid=(1,),
            in_specs=[
                pl.BlockSpec((n, f), lambda i, perm_ref, ssel_ref: (0, 0)),
            ],
            out_specs=(
                pl.BlockSpec((k_pad, f), lambda i, perm_ref, ssel_ref: (0, 0)),
                pl.BlockSpec((k_pad, f), lambda i, perm_ref, ssel_ref: (0, 0)),
            ),
        ),
        compiler_params=pltpu.CompilerParams(
            dimension_semantics=("arbitrary",),
            vmem_limit_bytes=32 * 1024 * 1024,
        ),
    )(perm_pad, ssel_pad, x)


def pool_unpool_graph(x, edge_index, batch, params, *, nodes_per_graph, ratio=0.5):
    """Forward of PoolUnpoolGraph (SAGPooling ratio=0.5, GNN=GraphConv, tanh)."""
    n, _ = x.shape
    src, dst = edge_index[0], edge_index[1]

    # Fold the [F,1] GraphConv projections into the aggregation (associativity):
    #   score = tanh(A @ (x @ w_rel) + x @ w_root + b)
    xw = x @ params["w_rel"]                                           # [N, 1]
    xr = (x @ params["w_root"] + params["b_rel"]).reshape(1, n)        # [1, N]

    # Pad N up to a tile multiple so the score kernel always pipelines (no single
    # full-extent (N,N) fallback block for odd N).
    tile = min(_TILE, _round_up(n, _MIN_ALIGN))
    n_pad = _round_up(n, tile)
    xw_col = jnp.zeros((n_pad, 1), jnp.float32).at[:n].set(xw)
    xr_row = jnp.zeros((1, n_pad), jnp.float32).at[:, :n].set(xr)

    # Transposed dense adjacency built DIRECTLY in its kernel dtype (int8, exact
    # for edge multiplicities <= 127): At[src, dst] += 1, so the scatter-add
    # aggregation becomes the lane-dense row score[0,i] = sum_j xw[j] * At[j,i].
    # TODO(synk): store the adjacency as fp8 (e4m3) on v7x if an MXU dot path is
    # ever reinstated; for sparse graphs (E << N^2) replace the dense sweep with
    # segment_sum(xw[src], dst, N) or a Pallas edge-list kernel (biggest win).
    at = jnp.zeros((n_pad, n_pad), jnp.int8).at[src, dst].add(jnp.int8(1))

    score_row = _sag_score_row(xw_col, at, xr_row)                     # [1, n_pad]
    score = score_row[0, :n]

    # Per-graph top-k (ratio=0.5).  tanh is monotonic, so top-k on tanh(score)
    # equals PyG's top-k on the raw score.  Static shapes require contiguous,
    # equal-size graphs.
    # TODO(synk): PyG topk handles ragged graph sizes (data-dependent output sizes).
    g = n // nodes_per_graph
    k = math.ceil(ratio * nodes_per_graph)
    k_total = g * k
    score_g = score.reshape(g, nodes_per_graph)
    _, local_idx = jax.lax.top_k(score_g, k)                           # [G, k]
    perm = (local_idx + (jnp.arange(g) * nodes_per_graph)[:, None]).reshape(-1)
    perm = perm.astype(jnp.int32)

    # Row gather + SAGPooling feature scaling inside Pallas (SMEM perm + scores,
    # 8 rows per store).  Pad K to a sublane-tile multiple; slice back afterwards.
    k_pad = max(8, _round_up(k_total, 8))
    perm_pad = jnp.zeros((k_pad,), jnp.int32).at[:k_total].set(perm)
    ssel_pad = jnp.zeros((k_pad,), jnp.float32).at[:k_total].set(score[perm])
    xu_pad, xcg_pad = _gather_scale(perm_pad, ssel_pad, x)
    x_unpooled = xu_pad[:k_total]
    x_cg = xcg_pad[:k_total]

    new_batch = batch[perm]

    # filter_adj: keep edges whose endpoints are both retained, relabel, map back
    # to original node ids (edge_index_unpooled = perm[edge_index_cg]).
    # TODO(synk): PyTorch returns a dynamically sized [2, E_kept] tensor; here it
    # is padded to [2, E] with -1 sentinels and the valid-edge count is returned.
    new_idx = jnp.full((n,), -1, jnp.int32).at[perm].set(
        jnp.arange(k_total, dtype=jnp.int32))
    src_new, dst_new = new_idx[src], new_idx[dst]
    keep = (src_new >= 0) & (dst_new >= 0)
    order = jnp.argsort((~keep).astype(jnp.int32), stable=True)        # kept edges first
    keep_s = keep[order]
    src_cg = jnp.where(keep_s, src_new[order], -1)
    dst_cg = jnp.where(keep_s, dst_new[order], -1)
    num_edges_kept = keep.sum()

    eu_src = jnp.where(keep_s, perm[jnp.clip(src_cg, 0, k_total - 1)], -1)
    eu_dst = jnp.where(keep_s, perm[jnp.clip(dst_cg, 0, k_total - 1)], -1)
    edge_index_unpooled = jnp.stack([eu_src, eu_dst], axis=0)          # [2, E] padded

    return x_unpooled, x_cg, edge_index_unpooled, new_batch, num_edges_kept


# --------------------------------- main ------------------------------------ #

if __name__ == "__main__":
    key = jax.random.PRNGKey(0)
    kx, kr, kt = jax.random.split(key, 3)

    N, F = 8, 4            # 8 nodes, num_node_features = 4
    NODES_PER_GRAPH = 4    # two graphs of 4 nodes each
    x = jax.random.normal(kx, (N, F), jnp.float32)
    batch = jnp.array([0, 0, 0, 0, 1, 1, 1, 1], jnp.int32)

    # Two 4-node bidirectional ring graphs -> E = 16 directed edges.
    e0 = jnp.array(
        [[0, 1], [1, 0], [1, 2], [2, 1], [2, 3], [3, 2], [3, 0], [0, 3]], jnp.int32
    )
    e1 = e0 + 4
    edge_index = jnp.concatenate([e0, e1], axis=0).T.astype(jnp.int32)  # [2, 16]

    # GraphConv(F -> 1) parameters: lin_rel (weight + bias), lin_root (weight).
    params = {
        "w_rel": jax.random.normal(kr, (F, 1), jnp.float32) * 0.5,
        "w_root": jax.random.normal(kt, (F, 1), jnp.float32) * 0.5,
        "b_rel": jnp.full((1, 1), 0.1, jnp.float32),
    }

    fwd = jax.jit(pool_unpool_graph, static_argnames=("nodes_per_graph", "ratio"))
    outs = fwd(x, edge_index, batch, params, nodes_per_graph=NODES_PER_GRAPH)
    jax.block_until_ready(outs)

    x_unpooled, x_cg, edge_index_unpooled, new_batch, num_edges_kept = outs
    assert x_unpooled.shape == (4, F)
    assert x_cg.shape == (4, F)
    assert edge_index_unpooled.shape == (2, 16)
    assert new_batch.shape == (4,)

    # Pure-JAX reference for the pooled / gathered features.
    adj = jnp.zeros((N, N), jnp.float32).at[edge_index[1], edge_index[0]].add(1.0)
    score_ref = jnp.tanh(
        adj @ (x @ params["w_rel"]) + x @ params["w_root"] + params["b_rel"]
    )[:, 0]
    _, li = jax.lax.top_k(score_ref.reshape(-1, NODES_PER_GRAPH), NODES_PER_GRAPH // 2)
    perm_ref = (li + (jnp.arange(N // NODES_PER_GRAPH) * NODES_PER_GRAPH)[:, None]).reshape(-1)
    assert jnp.allclose(x_unpooled, x[perm_ref], rtol=1e-4, atol=1e-5)
    assert jnp.allclose(
        x_cg, x[perm_ref] * score_ref[perm_ref][:, None], rtol=1e-4, atol=1e-5
    )

    print("KERNEL_OK")
</pallas_src>

<mosaic_0001>
module attributes {stable_mosaic.version = 11 : i64} {
  func.func @_score_kernel(%arg0: i32, %arg1: i32, %arg2: memref<256x1xf32, #tpu.memory_space<vmem>>, %arg3: memref<256x256xi8, #tpu.memory_space<vmem>>, %arg4: memref<1x256xf32, #tpu.memory_space<vmem>>, %arg5: memref<1x256xf32, #tpu.memory_space<vmem>>, %arg6: memref<1x256xf32, #tpu.memory_space<vmem>>) attributes {dimension_semantics = [#tpu.dimension_semantics<parallel>, #tpu.dimension_semantics<arbitrary>], iteration_bounds = array<i64: 1, 1>, scalar_prefetch = 0 : i64, scratch_operands = 1 : i64, tpu.core_type = #tpu.core_type<tc>, window_params = [{transform_indices = @transform_0, window_bounds = array<i64: 256, 1>}, {transform_indices = @transform_1, window_bounds = array<i64: 256, 256>}, {transform_indices = @transform_2, window_bounds = array<i64: 1, 256>}, {transform_indices = @transform_3, window_bounds = array<i64: 1, 256>}]} {
    %c0_i32 = arith.constant 0 : i32
    %0 = arith.cmpi eq, %arg1, %c0_i32 : i32
    %1 = arith.extui %0 : i1 to i32
    %c0_i32_0 = arith.constant 0 : i32
    %2 = arith.cmpi ne, %1, %c0_i32_0 : i32
    scf.if %2 {
      %cst_10 = arith.constant 0.000000e+00 : f32
      %16 = vector.broadcast %cst_10 : f32 to vector<1x256xf32>
      %c0_11 = arith.constant 0 : index
      %c0_12 = arith.constant 0 : index
      %17 = vector.load %arg6[%c0_11, %c0_12] : memref<1x256xf32, #tpu.memory_space<vmem>>, vector<1x256xf32>
      tpu.vector_store %arg6[%c0_11, %c0_12], %16 {strides = array<i32>} : memref<1x256xf32, #tpu.memory_space<vmem>>, vector<1x256xf32>,
    } else {
    }
    %c0 = arith.constant 0 : index
    %c0_1 = arith.constant 0 : index
    %3 = vector.load %arg3[%c0, %c0_1] : memref<256x256xi8, #tpu.memory_space<vmem>>, vector<256x256xi8>
    %4 = arith.sitofp %3 : vector<256x256xi8> to vector<256x256xf32>
    %c0_2 = arith.constant 0 : index
    %c0_3 = arith.constant 0 : index
    %5 = vector.load %arg2[%c0_2, %c0_3] : memref<256x1xf32, #tpu.memory_space<vmem>>, vector<256x1xf32>
    %6 = vector.broadcast %5 : vector<256x1xf32> to vector<256x256xf32>
    %7 = arith.mulf %4, %6 : vector<256x256xf32>
    %c0_4 = arith.constant 0 : index
    %c0_5 = arith.constant 0 : index
    %8 = vector.load %arg6[%c0_4, %c0_5] : memref<1x256xf32, #tpu.memory_space<vmem>>, vector<1x256xf32>
    %cst = arith.constant dense<0.000000e+00> : vector<256xf32>
    %9 = vector.multi_reduction <add>, %7, %cst [0] : vector<256x256xf32> to vector<256xf32>
    %10 = vector.shape_cast %9 : vector<256xf32> to vector<1x256xf32>
    %11 = arith.addf %8, %10 : vector<1x256xf32>
    %c0_6 = arith.constant 0 : index
    %c0_7 = arith.constant 0 : index
    %12 = vector.load %arg6[%c0_6, %c0_7] : memref<1x256xf32, #tpu.memory_space<vmem>>, vector<1x256xf32>
    tpu.vector_store %arg6[%c0_6, %c0_7], %11 {strides = array<i32>} : memref<1x256xf32, #tpu.memory_space<vmem>>, vector<1x256xf32>,
    %c0_i32_8 = arith.constant 0 : i32
    %13 = arith.cmpi eq, %arg1, %c0_i32_8 : i32
    %14 = arith.extui %13 : i1 to i32
    %c0_i32_9 = arith.constant 0 : i32
    %15 = arith.cmpi ne, %14, %c0_i32_9 : i32
    scf.if %15 {
      %c0_10 = arith.constant 0 : index
      %c0_11 = arith.constant 0 : index
      %16 = vector.load %arg6[%c0_10, %c0_11] : memref<1x256xf32, #tpu.memory_space<vmem>>, vector<1x256xf32>
      %c0_12 = arith.constant 0 : index
      %c0_13 = arith.constant 0 : index
      %17 = vector.load %arg4[%c0_12, %c0_13] : memref<1x256xf32, #tpu.memory_space<vmem>>, vector<1x256xf32>
      %18 = arith.addf %16, %17 : vector<1x256xf32>
      %19 = math.tanh %18 : vector<1x256xf32>
      %c0_14 = arith.constant 0 : index
      %c0_15 = arith.constant 0 : index
      %20 = vector.load %arg5[%c0_14, %c0_15] : memref<1x256xf32, #tpu.memory_space<vmem>>, vector<1x256xf32>
      tpu.vector_store %arg5[%c0_14, %c0_15], %19 {strides = array<i32>} : memref<1x256xf32, #tpu.memory_space<vmem>>, vector<1x256xf32>,
    } else {
    }
    return
  }
  func.func @transform_0(%arg0: i32, %arg1: i32) -> (i32, i32) {
    %c0_i32 = arith.constant 0 : i32
    %c0_i32_0 = arith.constant 0 : i32
    return %arg1, %c0_i32 : i32, i32
  }
  func.func @transform_1(%arg0: i32, %arg1: i32) -> (i32, i32) {
    %c0_i32 = arith.constant 0 : i32
    return %arg1, %arg0 : i32, i32
  }
  func.func @transform_2(%arg0: i32, %arg1: i32) -> (i32, i32) {
    %c0_i32 = arith.constant 0 : i32
    %c0_i32_0 = arith.constant 0 : i32
    return %c0_i32, %arg0 : i32, i32
  }
  func.func @transform_3(%arg0: i32, %arg1: i32) -> (i32, i32) {
    %c0_i32 = arith.constant 0 : i32
    %c0_i32_0 = arith.constant 0 : i32
    return %c0_i32, %arg0 : i32, i32
  }
}

module attributes {stable_mosaic.version = 11 : i64} {
  func.func @_gather_scale_kernel(%arg0: i32, %arg1: memref<8xi32, #tpu.memory_space<smem>>, %arg2: memref<8xf32, #tpu.memory_space<smem>>, %arg3: memref<8x4xf32, #tpu.memory_space<vmem>>, %arg4: memref<8x4xf32, #tpu.memory_space<vmem>>, %arg5: memref<8x4xf32, #tpu.memory_space<vmem>>) attributes {dimension_semantics = [#tpu.dimension_semantics<arbitrary>], iteration_bounds = array<i64: 1>, scalar_prefetch = 2 : i64, scratch_operands = 0 : i64, tpu.core_type = #tpu.core_type<tc>, window_params = [{pipeline_mode = #tpu.pipeline_mode<synchronous>, transform_indices = @transform_0, window_bounds = array<i64: 8, 4>}, {pipeline_mode = #tpu.pipeline_mode<synchronous>, transform_indices = @transform_1, window_bounds = array<i64: 8, 4>}, {pipeline_mode = #tpu.pipeline_mode<synchronous>, transform_indices = @transform_2, window_bounds = array<i64: 8, 4>}]} {
    %0 = tpu.iota {dimensions = array<i32: 0>} : vector<8x1xi32>
    %c0_i32 = arith.constant 0 : i32
    %c8_i32 = arith.constant 8 : i32
    %1 = arith.muli %c0_i32, %c8_i32 : i32
    %2 = tpu.assume_multiple %1, 8 : i32
    %cst = arith.constant 0.000000e+00 : f32
    %3 = vector.broadcast %cst : f32 to vector<8x4xf32>
    %cst_0 = arith.constant 0.000000e+00 : f32
    %4 = vector.broadcast %cst_0 : f32 to vector<8x4xf32>
    %c0_i32_1 = arith.constant 0 : i32
    %5 = arith.addi %2, %c0_i32_1 : i32
    %6 = arith.index_cast %5 : i32 to index
    %7 = memref.load %arg1[%6] : memref<8xi32, #tpu.memory_space<smem>>
    %8 = arith.index_cast %7 : i32 to index
    %c0 = arith.constant 0 : index
    %9 = vector.load %arg3[%8, %c0] : memref<8x4xf32, #tpu.memory_space<vmem>>, vector<1x4xf32>
    %c0_i32_2 = arith.constant 0 : i32
    %10 = arith.addi %2, %c0_i32_2 : i32
    %11 = arith.index_cast %10 : i32 to index
    %12 = memref.load %arg2[%11] : memref<8xf32, #tpu.memory_space<smem>>
    %c0_i32_3 = arith.constant 0 : i32
    %13 = vector.broadcast %c0_i32_3 : i32 to vector<8x1xi32>
    %14 = arith.cmpi eq, %0, %13 : vector<8x1xi32>
    %15 = vector.shape_cast %14 : vector<8x1xi1> to vector<8x1xi1>
    %16 = vector.broadcast %15 : vector<8x1xi1> to vector<8x4xi1>
    %17 = vector.shape_cast %9 : vector<1x4xf32> to vector<1x4xf32>
    %18 = vector.broadcast %17 : vector<1x4xf32> to vector<8x4xf32>
    %19 = arith.select %16, %18, %3 : vector<8x4xi1>, vector<8x4xf32>
    %20 = vector.broadcast %12 : f32 to vector<1x4xf32>
    %21 = arith.mulf %9, %20 : vector<1x4xf32>
    %22 = vector.shape_cast %14 : vector<8x1xi1> to vector<8x1xi1>
    %23 = vector.broadcast %22 : vector<8x1xi1> to vector<8x4xi1>
    %24 = vector.shape_cast %21 : vector<1x4xf32> to vector<1x4xf32>
    %25 = vector.broadcast %24 : vector<1x4xf32> to vector<8x4xf32>
    %26 = arith.select %23, %25, %4 : vector<8x4xi1>, vector<8x4xf32>
    %c1_i32 = arith.constant 1 : i32
    %27 = arith.addi %2, %c1_i32 : i32
    %28 = arith.index_cast %27 : i32 to index
    %29 = memref.load %arg1[%28] : memref<8xi32, #tpu.memory_space<smem>>
    %30 = arith.index_cast %29 : i32 to index
    %c0_4 = arith.constant 0 : index
    %31 = vector.load %arg3[%30, %c0_4] : memref<8x4xf32, #tpu.memory_space<vmem>>, vector<1x4xf32>
    %c1_i32_5 = arith.constant 1 : i32
    %32 = arith.addi %2, %c1_i32_5 : i32
    %33 = arith.index_cast %32 : i32 to index
    %34 = memref.load %arg2[%33] : memref<8xf32, #tpu.memory_space<smem>>
    %c1_i32_6 = arith.constant 1 : i32
    %35 = vector.broadcast %c1_i32_6 : i32 to vector<8x1xi32>
    %36 = arith.cmpi eq, %0, %35 : vector<8x1xi32>
    %37 = vector.shape_cast %36 : vector<8x1xi1> to vector<8x1xi1>
    %38 = vector.broadcast %37 : vector<8x1xi1> to vector<8x4xi1>
    %39 = vector.shape_cast %31 : vector<1x4xf32> to vector<1x4xf32>
    %40 = vector.broadcast %39 : vector<1x4xf32> to vector<8x4xf32>
    %41 = arith.select %38, %40, %19 : vector<8x4xi1>, vector<8x4xf32>
    %42 = vector.broadcast %34 : f32 to vector<1x4xf32>
    %43 = arith.mulf %31, %42 : vector<1x4xf32>
    %44 = vector.shape_cast %36 : vector<8x1xi1> to vector<8x1xi1>
    %45 = vector.broadcast %44 : vector<8x1xi1> to vector<8x4xi1>
    %46 = vector.shape_cast %43 : vector<1x4xf32> to vector<1x4xf32>
    %47 = vector.broadcast %46 : vector<1x4xf32> to vector<8x4xf32>
    %48 = arith.select %45, %47, %26 : vector<8x4xi1>, vector<8x4xf32>
    %c2_i32 = arith.constant 2 : i32
    %49 = arith.addi %2, %c2_i32 : i32
    %50 = arith.index_cast %49 : i32 to index
    %51 = memref.load %arg1[%50] : memref<8xi32, #tpu.memory_space<smem>>
    %52 = arith.index_cast %51 : i32 to index
    %c0_7 = arith.constant 0 : index
    %53 = vector.load %arg3[%52, %c0_7] : memref<8x4xf32, #tpu.memory_space<vmem>>, vector<1x4xf32>
    %c2_i32_8 = arith.constant 2 : i32
    %54 = arith.addi %2, %c2_i32_8 : i32
    %55 = arith.index_cast %54 : i32 to index
    %56 = memref.load %arg2[%55] : memref<8xf32, #tpu.memory_space<smem>>
    %c2_i32_9 = arith.constant 2 : i32
    %57 = vector.broadcast %c2_i32_9 : i32 to vector<8x1xi32>
    %58 = arith.cmpi eq, %0, %57 : vector<8x1xi32>
    %59 = vector.shape_cast %58 : vector<8x1xi1> to vector<8x1xi1>
    %60 = vector.broadcast %59 : vector<8x1xi1> to vector<8x4xi1>
    %61 = vector.shape_cast %53 : vector<1x4xf32> to vector<1x4xf32>
    %62 = vector.broadcast %61 : vector<1x4xf32> to vector<8x4xf32>
    %63 = arith.select %60, %62, %41 : vector<8x4xi1>, vector<8x4xf32>
    %64 = vector.broadcast %56 : f32 to vector<1x4xf32>
    %65 = arith.mulf %53, %64 : vector<1x4xf32>
    %66 = vector.shape_cast %58 : vector<8x1xi1> to vector<8x1xi1>
    %67 = vector.broadcast %66 : vector<8x1xi1> to vector<8x4xi1>
    %68 = vector.shape_cast %65 : vector<1x4xf32> to vector<1x4xf32>
    %69 = vector.broadcast %68 : vector<1x4xf32> to vector<8x4xf32>
    %70 = arith.select %67, %69, %48 : vector<8x4xi1>, vector<8x4xf32>
    %c3_i32 = arith.constant 3 : i32
    %71 = arith.addi %2, %c3_i32 : i32
    %72 = arith.index_cast %71 : i32 to index
    %73 = memref.load %arg1[%72] : memref<8xi32, #tpu.memory_space<smem>>
    %74 = arith.index_cast %73 : i32 to index
    %c0_10 = arith.constant 0 : index
    %75 = vector.load %arg3[%74, %c0_10] : memref<8x4xf32, #tpu.memory_space<vmem>>, vector<1x4xf32>
    %c3_i32_11 = arith.constant 3 : i32
    %76 = arith.addi %2, %c3_i32_11 : i32
    %77 = arith.index_cast %76 : i32 to index
    %78 = memref.load %arg2[%77] : memref<8xf32, #tpu.memory_space<smem>>
    %c3_i32_12 = arith.constant 3 : i32
    %79 = vector.broadcast %c3_i32_12 : i32 to vector<8x1xi32>
    %80 = arith.cmpi eq, %0, %79 : vector<8x1xi32>
    %81 = vector.shape_cast %80 : vector<8x1xi1> to vector<8x1xi1>
    %82 = vector.broadcast %81 : vector<8x1xi1> to vector<8x4xi1>
    %83 = vector.shape_cast %75 : vector<1x4xf32> to vector<1x4xf32>
    %84 = vector.broadcast %83 : vector<1x4xf32> to vector<8x4xf32>
    %85 = arith.select %82, %84, %63 : vector<8x4xi1>, vector<8x4xf32>
    %86 = vector.broadcast %78 : f32 to vector<1x4xf32>
    %87 = arith.mulf %75, %86 : vector<1x4xf32>
    %88 = vector.shape_cast %80 : vector<8x1xi1> to vector<8x1xi1>
    %89 = vector.broadcast %88 : vector<8x1xi1> to vector<8x4xi1>
    %90 = vector.shape_cast %87 : vector<1x4xf32> to vector<1x4xf32>
    %91 = vector.broadcast %90 : vector<1x4xf32> to vector<8x4xf32>
    %92 = arith.select %89, %91, %70 : vector<8x4xi1>, vector<8x4xf32>
    %c4_i32 = arith.constant 4 : i32
    %93 = arith.addi %2, %c4_i32 : i32
    %94 = arith.index_cast %93 : i32 to index
    %95 = memref.load %arg1[%94] : memref<8xi32, #tpu.memory_space<smem>>
    %96 = arith.index_cast %95 : i32 to index
    %c0_13 = arith.constant 0 : index
    %97 = vector.load %arg3[%96, %c0_13] : memref<8x4xf32, #tpu.memory_space<vmem>>, vector<1x4xf32>
    %c4_i32_14 = arith.constant 4 : i32
    %98 = arith.addi %2, %c4_i32_14 : i32
    %99 = arith.index_cast %98 : i32 to index
    %100 = memref.load %arg2[%99] : memref<8xf32, #tpu.memory_space<smem>>
    %c4_i32_15 = arith.constant 4 : i32
    %101 = vector.broadcast %c4_i32_15 : i32 to vector<8x1xi32>
    %102 = arith.cmpi eq, %0, %101 : vector<8x1xi32>
    %103 = vector.shape_cast %102 : vector<8x1xi1> to vector<8x1xi1>
    %104 = vector.broadcast %103 : vector<8x1xi1> to vector<8x4xi1>
    %105 = vector.shape_cast %97 : vector<1x4xf32> to vector<1x4xf32>
    %106 = vector.broadcast %105 : vector<1x4xf32> to vector<8x4xf32>
    %107 = arith.select %104, %106, %85 : vector<8x4xi1>, vector<8x4xf32>
    %108 = vector.broadcast %100 : f32 to vector<1x4xf32>
    %109 = arith.mulf %97, %108 : vector<1x4xf32>
    %110 = vector.shape_cast %102 : vector<8x1xi1> to vector<8x1xi1>
    %111 = vector.broadcast %110 : vector<8x1xi1> to vector<8x4xi1>
    %112 = vector.shape_cast %109 : vector<1x4xf32> to vector<1x4xf32>
    %113 = vector.broadcast %112 : vector<1x4xf32> to vector<8x4xf32>
    %114 = arith.select %111, %113, %92 : vector<8x4xi1>, vector<8x4xf32>
    %c5_i32 = arith.constant 5 : i32
    %115 = arith.addi %2, %c5_i32 : i32
    %116 = arith.index_cast %115 : i32 to index
    %117 = memref.load %arg1[%116] : memref<8xi32, #tpu.memory_space<smem>>
    %118 = arith.index_cast %117 : i32 to index
    %c0_16 = arith.constant 0 : index
    %119 = vector.load %arg3[%118, %c0_16] : memref<8x4xf32, #tpu.memory_space<vmem>>, vector<1x4xf32>
    %c5_i32_17 = arith.constant 5 : i32
    %120 = arith.addi %2, %c5_i32_17 : i32
    %121 = arith.index_cast %120 : i32 to index
    %122 = memref.load %arg2[%121] : memref<8xf32, #tpu.memory_space<smem>>
    %c5_i32_18 = arith.constant 5 : i32
    %123 = vector.broadcast %c5_i32_18 : i32 to vector<8x1xi32>
    %124 = arith.cmpi eq, %0, %123 : vector<8x1xi32>
    %125 = vector.shape_cast %124 : vector<8x1xi1> to vector<8x1xi1>
    %126 = vector.broadcast %125 : vector<8x1xi1> to vector<8x4xi1>
    %127 = vector.shape_cast %119 : vector<1x4xf32> to vector<1x4xf32>
    %128 = vector.broadcast %127 : vector<1x4xf32> to vector<8x4xf32>
    %129 = arith.select %126, %128, %107 : vector<8x4xi1>, vector<8x4xf32>
    %130 = vector.broadcast %122 : f32 to vector<1x4xf32>
    %131 = arith.mulf %119, %130 : vector<1x4xf32>
    %132 = vector.shape_cast %124 : vector<8x1xi1> to vector<8x1xi1>
    %133 = vector.broadcast %132 : vector<8x1xi1> to vector<8x4xi1>
    %134 = vector.shape_cast %131 : vector<1x4xf32> to vector<1x4xf32>
    %135 = vector.broadcast %134 : vector<1x4xf32> to vector<8x4xf32>
    %136 = arith.select %133, %135, %114 : vector<8x4xi1>, vector<8x4xf32>
    %c6_i32 = arith.constant 6 : i32
    %137 = arith.addi %2, %c6_i32 : i32
    %138 = arith.index_cast %137 : i32 to index
    %139 = memref.load %arg1[%138] : memref<8xi32, #tpu.memory_space<smem>>
    %140 = arith.index_cast %139 : i32 to index
    %c0_19 = arith.constant 0 : index
    %141 = vector.load %arg3[%140, %c0_19] : memref<8x4xf32, #tpu.memory_space<vmem>>, vector<1x4xf32>
    %c6_i32_20 = arith.constant 6 : i32
    %142 = arith.addi %2, %c6_i32_20 : i32
    %143 = arith.index_cast %142 : i32 to index
    %144 = memref.load %arg2[%143] : memref<8xf32, #tpu.memory_space<smem>>
    %c6_i32_21 = arith.constant 6 : i32
    %145 = vector.broadcast %c6_i32_21 : i32 to vector<8x1xi32>
    %146 = arith.cmpi eq, %0, %145 : vector<8x1xi32>
    %147 = vector.shape_cast %146 : vector<8x1xi1> to vector<8x1xi1>
    %148 = vector.broadcast %147 : vector<8x1xi1> to vector<8x4xi1>
    %149 = vector.shape_cast %141 : vector<1x4xf32> to vector<1x4xf32>
    %150 = vector.broadcast %149 : vector<1x4xf32> to vector<8x4xf32>
    %151 = arith.select %148, %150, %129 : vector<8x4xi1>, vector<8x4xf32>
    %152 = vector.broadcast %144 : f32 to vector<1x4xf32>
    %153 = arith.mulf %141, %152 : vector<1x4xf32>
    %154 = vector.shape_cast %146 : vector<8x1xi1> to vector<8x1xi1>
    %155 = vector.broadcast %154 : vector<8x1xi1> to vector<8x4xi1>
    %156 = vector.shape_cast %153 : vector<1x4xf32> to vector<1x4xf32>
    %157 = vector.broadcast %156 : vector<1x4xf32> to vector<8x4xf32>
    %158 = arith.select %155, %157, %136 : vector<8x4xi1>, vector<8x4xf32>
    %c7_i32 = arith.constant 7 : i32
    %159 = arith.addi %2, %c7_i32 : i32
    %160 = arith.index_cast %159 : i32 to index
    %161 = memref.load %arg1[%160] : memref<8xi32, #tpu.memory_space<smem>>
    %162 = arith.index_cast %161 : i32 to index
    %c0_22 = arith.constant 0 : index
    %163 = vector.load %arg3[%162, %c0_22] : memref<8x4xf32, #tpu.memory_space<vmem>>, vector<1x4xf32>
    %c7_i32_23 = arith.constant 7 : i32
    %164 = arith.addi %2, %c7_i32_23 : i32
    %165 = arith.index_cast %164 : i32 to index
    %166 = memref.load %arg2[%165] : memref<8xf32, #tpu.memory_space<smem>>
    %c7_i32_24 = arith.constant 7 : i32
    %167 = vector.broadcast %c7_i32_24 : i32 to vector<8x1xi32>
    %168 = arith.cmpi eq, %0, %167 : vector<8x1xi32>
    %169 = vector.shape_cast %168 : vector<8x1xi1> to vector<8x1xi1>
    %170 = vector.broadcast %169 : vector<8x1xi1> to vector<8x4xi1>
    %171 = vector.shape_cast %163 : vector<1x4xf32> to vector<1x4xf32>
    %172 = vector.broadcast %171 : vector<1x4xf32> to vector<8x4xf32>
    %173 = arith.select %170, %172, %151 : vector<8x4xi1>, vector<8x4xf32>
    %174 = vector.broadcast %166 : f32 to vector<1x4xf32>
    %175 = arith.mulf %163, %174 : vector<1x4xf32>
    %176 = vector.shape_cast %168 : vector<8x1xi1> to vector<8x1xi1>
    %177 = vector.broadcast %176 : vector<8x1xi1> to vector<8x4xi1>
    %178 = vector.shape_cast %175 : vector<1x4xf32> to vector<1x4xf32>
    %179 = vector.broadcast %178 : vector<1x4xf32> to vector<8x4xf32>
    %180 = arith.select %177, %179, %158 : vector<8x4xi1>, vector<8x4xf32>
    %181 = arith.index_cast %2 : i32 to index
    %c0_25 = arith.constant 0 : index
    %182 = vector.load %arg4[%181, %c0_25] : memref<8x4xf32, #tpu.memory_space<vmem>>, vector<8x4xf32>
    tpu.vector_store %arg4[%181, %c0_25], %173 {strides = array<i32>} : memref<8x4xf32, #tpu.memory_space<vmem>>, vector<8x4xf32>,
    %183 = arith.index_cast %2 : i32 to index
    %c0_26 = arith.constant 0 : index
    %184 = vector.load %arg5[%183, %c0_26] : memref<8x4xf32, #tpu.memory_space<vmem>>, vector<8x4xf32>
    tpu.vector_store %arg5[%183, %c0_26], %180 {strides = array<i32>} : memref<8x4xf32, #tpu.memory_space<vmem>>, vector<8x4xf32>,
    %c1_i32_27 = arith.constant 1 : i32
    return
  }
  func.func @transform_0(%arg0: i32, %arg1: memref<8xi32, #tpu.memory_space<smem>>, %arg2: memref<8xf32, #tpu.memory_space<smem>>) -> (i32, i32) {
    %c0_i32 = arith.constant 0 : i32
    %c0_i32_0 = arith.constant 0 : i32
    %c0_i32_1 = arith.constant 0 : i32
    return %c0_i32, %c0_i32_0 : i32, i32
  }
  func.func @transform_1(%arg0: i32, %arg1: memref<8xi32, #tpu.memory_space<smem>>, %arg2: memref<8xf32, #tpu.memory_space<smem>>) -> (i32, i32) {
    %c0_i32 = arith.constant 0 : i32
    %c0_i32_0 = arith.constant 0 : i32
    %c0_i32_1 = arith.constant 0 : i32
    return %c0_i32, %c0_i32_0 : i32, i32
  }
  func.func @transform_2(%arg0: i32, %arg1: memref<8xi32, #tpu.memory_space<smem>>, %arg2: memref<8xf32, #tpu.memory_space<smem>>) -> (i32, i32) {
    %c0_i32 = arith.constant 0 : i32
    %c0_i32_0 = arith.constant 0 : i32
    %c0_i32_1 = arith.constant 0 : i32
    return %c0_i32, %c0_i32_0 : i32, i32
  }
}

</mosaic_0001>

<bundles_post_ra>
// kernel: squeeze.7
= control target key start
LH: loop header
LB: loop body
LE: loop exit
PB: predicated region body
PF: predicated region fallthrough
CT: control target
= control target key end

     0   :  { %vm7_vm0 = vcmask 31744   ;;  %s39_s0 = inlined_call_operand.vmem [shape: f32[8], index: 0, kind: input, shape index: {}]   ;;  %s40_s1 = inlined_call_operand.vmem [shape: f32[2,4], index: 1, kind: output, shape index: {}]  }
   0x1   :  { %v4_v0 = vld [vmem:[%s39_s0] sm:$0x1]  ;;  %s22_s0 = smov 124  }
   0x2   :  { %5 = vst [vmem:[#allocation1] sm:$0x1] %v4_v0 }
   0x9   :  { %v9_v1 = vld [vmem:[#allocation1] sm:$0x1]  }
   0xa   :  { %v6_v2 = vld [vmem:[#allocation1] sm:$0x1]   ;;  %10 = vrot.lane.b32.xlu0 %v9_v1, %s22_s0 }
   0xb   :  { %8 = vst.msk [vmem:[#allocation0] sm:$0x1] %vm7_vm0, %v6_v2  }
  0x7c   :  { %v11_v3 = vpop.permute.xlu0 %10  }
  0x7d   :  { %14 = vst.msk [vmem:[#allocation0 + $0x1] sm:$0x1] %vm7_vm0, %v11_v3  }
  0x84   :  { %v17_v4 = vld [vmem:[#allocation0] sm:$0x3] }
  0x85   :  { %20 = vst [vmem:[%s40_s1] sm:$0x3] %v17_v4 }

// kernel: pool_unpool_graph.2
= control target key start
LH: loop header
LB: loop body
LE: loop exit
PB: predicated region body
PF: predicated region fallthrough
CT: control target
= control target key end

     0   :  { %v656_v0 = vmov 0   ;;  %vm517_vm1 = vcmask 1040384   ;;  %s850_s0 = inlined_call_operand.vmem [shape: f32[256,1], index: 0, kind: input, shape index: {}]   ;;  %s851_s1 = inlined_call_operand.vmem [shape: s8[256,256], index: 1, kind: input, shape index: {}]   ;;  %s852_s2 = inlined_call_operand.vmem [shape: f32[1,256], index: 2, kind: input, shape index: {}]   ;;  %s853_s3 = inlined_call_operand.vmem [shape: f32[1,256], index: 3, kind: output, shape index: {}]  }
   0x1   :  { %653 = vset.pattern.permute.xlu2 %v656_v0  ;;  %652 = vset.pattern.permute.xlu1 %v656_v0  ;;  %v187_v1 = vld [vmem:[%s850_s0 + $0x20] sm:$0xff]  ;;  %v185_v2 = vld [vmem:[%s850_s0 + $0x10] sm:$0xff]  ;;  %v188_v4 = vld [vmem:[%s850_s0 + $0x28] sm:$0xff] }
   0x2   :  { %v183_v3 = vld [vmem:[%s850_s0] sm:$0xff]  ;;  %651 = vset.pattern.permute.xlu0 %v656_v0  ;;  %237 = vperm.xlu2 %653, %v187_v1   ;;  %v186_v5 = vld [vmem:[%s850_s0 + $0x18] sm:$0xff]  ;;  %v184_v6 = vld [vmem:[%s850_s0 + $0x8] sm:$0xff] }
   0x3   :  { %227 = vperm.xlu1 %652, %v185_v2   ;;  %217 = vperm.xlu0 %651, %v183_v3   ;;  %v191_v7 = vld [vmem:[%s850_s0 + $0x40] sm:$0xff]  ;;  %v190_v8 = vld [vmem:[%s850_s0 + $0x38] sm:$0xff]  ;;  %v189_v9 = vld [vmem:[%s850_s0 + $0x30] sm:$0xff] }
   0x4   :  { %v194_v10 = vld [vmem:[%s850_s0 + $0x58] sm:$0xff]  ;;  %v193_v11 = vld [vmem:[%s850_s0 + $0x50] sm:$0xff]  ;;  %v192_v12 = vld [vmem:[%s850_s0 + $0x48] sm:$0xff] }
   0x5   :  { %v197_v13 = vld [vmem:[%s850_s0 + $0x70] sm:$0xff]  ;;  %v196_v14 = vld [vmem:[%s850_s0 + $0x68] sm:$0xff]  ;;  %v195_v15 = vld [vmem:[%s850_s0 + $0x60] sm:$0xff] }
   0x6   :  { %v200_v16 = vld [vmem:[%s850_s0 + $0x88] sm:$0xff]  ;;  %v199_v17 = vld [vmem:[%s850_s0 + $0x80] sm:$0xff]  ;;  %v198_v18 = vld [vmem:[%s850_s0 + $0x78] sm:$0xff] }
   0x7   :  { %v203_v19 = vld [vmem:[%s850_s0 + $0xa0] sm:$0xff]  ;;  %v202_v20 = vld [vmem:[%s850_s0 + $0x98] sm:$0xff]  ;;  %v201_v21 = vld [vmem:[%s850_s0 + $0x90] sm:$0xff] }
   0x8   :  { %v206_v22 = vld [vmem:[%s850_s0 + $0xb8] sm:$0xff]  ;;  %v205_v23 = vld [vmem:[%s850_s0 + $0xb0] sm:$0xff]  ;;  %v204_v24 = vld [vmem:[%s850_s0 + $0xa8] sm:$0xff] }
   0x9   :  { %v209_v25 = vld [vmem:[%s850_s0 + $0xd0] sm:$0xff]  ;;  %v208_v26 = vld [vmem:[%s850_s0 + $0xc8] sm:$0xff]  ;;  %v207_v27 = vld [vmem:[%s850_s0 + $0xc0] sm:$0xff] }
   0xa   :  { %242 = vperm.xlu2 %653, %v188_v4   ;;  %v212_v28 = vld [vmem:[%s850_s0 + $0xe8] sm:$0xff]  ;;  %v211_v29 = vld [vmem:[%s850_s0 + $0xe0] sm:$0xff]  ;;  %v210_v30 = vld [vmem:[%s850_s0 + $0xd8] sm:$0xff] }
   0xb   :  { %232 = vperm.xlu1 %652, %v186_v5   ;;  %222 = vperm.xlu0 %651, %v184_v6   ;;  %v214_v31 = vld [vmem:[%s850_s0 + $0xf8] sm:$0xff]  ;;  %v213_v32 = vld [vmem:[%s850_s0 + $0xf0] sm:$0xff]  ;;  %v539_v35 = vld [vmem:[%s851_s1] sm:$0xff]  }
   0xc   :  { %v634_v36 = vld [vmem:[%s851_s1 + $0x8] sm:$0xff]   ;;  %v540_v39 = vunpack.c.0.s8 %v539_v35  ;;  %v541_v40 = vunpack.c.1.s8 %v539_v35  ;;  %v542_v41 = vunpack.c.2.s8 %v539_v35  ;;  %v543_v42 = vunpack.c.3.s8 %v539_v35  ;;  %v635_v43 = vld [vmem:[%s851_s1 + $0x10] sm:$0xff]   ;;  %v636_v57 = vld [vmem:[%s851_s1 + $0x18] sm:$0xff]  }
   0xd   :  { %v546_v44 = vunpack.c.0.s8 %v634_v36  ;;  %v547_v45 = vunpack.c.1.s8 %v634_v36  ;;  %v548_v46 = vunpack.c.2.s8 %v634_v36  ;;  %v549_v47 = vunpack.c.3.s8 %v634_v36 }
   0xe   :  { %v119_v49 = vcvt.s32.f32 %v540_v39  ;;  %v120_v50 = vcvt.s32.f32 %v541_v40  ;;  %v121_v51 = vcvt.s32.f32 %v542_v41  ;;  %v122_v52 = vcvt.s32.f32 %v543_v42 }
   0xf   :  { %v552_v53 = vunpack.c.0.s8 %v635_v43  ;;  %v553_v54 = vunpack.c.1.s8 %v635_v43  ;;  %v123_v55 = vcvt.s32.f32 %v546_v44  ;;  %v124_v56 = vcvt.s32.f32 %v547_v45 }
  0x10   :  { %v554_v58 = vunpack.c.2.s8 %v635_v43  ;;  %v555_v59 = vunpack.c.3.s8 %v635_v43  ;;  %v125_v60 = vcvt.s32.f32 %v548_v46  ;;  %v126_v61 = vcvt.s32.f32 %v549_v47  ;;  %v638_v43 = vld [vmem:[%s851_s1 + $0x28] sm:$0xff]  }
  0x11   :  { %v127_v4 = vcvt.s32.f32 %v552_v53  ;;  %v128_v5 = vcvt.s32.f32 %v553_v54  ;;  %v558_v6 = vunpack.c.0.s8 %v636_v57  ;;  %v572_v54 = vunpack.c.2.s8 %v638_v43 }
  0x12   :  { %257 = vperm.xlu2 %653, %v191_v7   ;;  %v559_v7 = vunpack.c.1.s8 %v636_v57 }
  0x13   :  { %252 = vperm.xlu1 %652, %v190_v8   ;;  %247 = vperm.xlu0 %651, %v189_v9   ;;  %v637_v8 = vld [vmem:[%s851_s1 + $0x20] sm:$0xff]  }
  0x14   :  { %v566_v41 = vunpack.c.2.s8 %v637_v8  ;;  %v567_v42 = vunpack.c.3.s8 %v637_v8 }
  0x1a   :  { %272 = vperm.xlu2 %653, %v194_v10  }
  0x1b   :  { %267 = vperm.xlu1 %652, %v193_v11   ;;  %262 = vperm.xlu0 %651, %v192_v12  }
  0x22   :  { %287 = vperm.xlu2 %653, %v197_v13   ;;  %v129_v13 = vcvt.s32.f32 %v554_v58  ;;  %v639_v58 = vld [vmem:[%s851_s1 + $0x30] sm:$0xff]  }
  0x23   :  { %282 = vperm.xlu1 %652, %v196_v14   ;;  %277 = vperm.xlu0 %651, %v195_v15   ;;  %v130_v14 = vcvt.s32.f32 %v555_v59  ;;  %v560_v15 = vunpack.c.2.s8 %v636_v57 }
  0x2a   :  { %302 = vperm.xlu2 %653, %v200_v16   ;;  %v561_v16 = vunpack.c.3.s8 %v636_v57  ;;  %v138_v57 = vcvt.s32.f32 %v567_v42 }
  0x2b   :  { %297 = vperm.xlu1 %652, %v199_v17   ;;  %292 = vperm.xlu0 %651, %v198_v18  }
  0x32   :  { %317 = vperm.xlu2 %653, %v203_v19  }
  0x33   :  { %312 = vperm.xlu1 %652, %v202_v20   ;;  %307 = vperm.xlu0 %651, %v201_v21  }
  0x3a   :  { %332 = vperm.xlu2 %653, %v206_v22  }
  0x3b   :  { %327 = vperm.xlu1 %652, %v205_v23   ;;  %322 = vperm.xlu0 %651, %v204_v24   ;;  %v564_v23 = vunpack.c.0.s8 %v637_v8  ;;  %v565_v24 = vunpack.c.1.s8 %v637_v8 }
  0x3d   :  { %v135_v40 = vcvt.s32.f32 %v564_v23 }
  0x42   :  { %347 = vperm.xlu2 %653, %v209_v25  }
  0x43   :  { %342 = vperm.xlu1 %652, %v208_v26   ;;  %337 = vperm.xlu0 %651, %v207_v27  }
  0x4a   :  { %362 = vperm.xlu2 %653, %v212_v28   ;;  %v131_v28 = vcvt.s32.f32 %v558_v6  ;;  %v576_v6 = vunpack.c.0.s8 %v639_v58 }
  0x4b   :  { %357 = vperm.xlu1 %652, %v211_v29   ;;  %352 = vperm.xlu0 %651, %v210_v30   ;;  %v132_v29 = vcvt.s32.f32 %v559_v7  ;;  %v133_v30 = vcvt.s32.f32 %v560_v15  ;;  %v577_v7 = vunpack.c.1.s8 %v639_v58 }
  0x53   :  { %372 = vperm.xlu1 %652, %v214_v31   ;;  %367 = vperm.xlu0 %651, %v213_v32   ;;  %v134_v31 = vcvt.s32.f32 %v561_v16 }
  0x5c   :  { %v238_v33 = vpop.permute.xlu2 %237 }
  0x5d   :  { %v383_v21 = vmul.f32 %v238_v33, %v127_v4  ;;  %v384_v22 = vmul.f32 %v238_v33, %v128_v5  ;;  %v136_v33 = vcvt.s32.f32 %v565_v24 }
  0x64   :  { %v774_v34 = vpop.permute.xlu2 %242 }
  0x65   :  { %v385_v36 = vmul.f32 %v774_v34, %v129_v13  ;;  %v579_v13 = vunpack.c.3.s8 %v639_v58 }
  0x6c   :  { %v785_v48 = vpop.permute.xlu2 %257 }
  0x6d   :  { %v391_v59 = vmul.f32 %v785_v48, %v135_v40 }
  0x74   :  { %v793_v25 = vpop.permute.xlu2 %272 }
  0x75   :  { %v228_v37 = vpop.permute.xlu1 %227  ;;  %v218_v38 = vpop.permute.xlu0 %217 }
  0x76   :  { %v375_v0 = vmul.f32 %v218_v38, %v119_v49  ;;  %v376_v1 = vmul.f32 %v218_v38, %v120_v50  ;;  %v379_v9 = vmul.f32 %v228_v37, %v123_v55  ;;  %v380_v10 = vmul.f32 %v228_v37, %v124_v56 }
  0x77   :  { %v386_v37 = vmul.f32 %v774_v34, %v130_v14  ;;  %v570_v49 = vunpack.c.0.s8 %v638_v43  ;;  %v571_v50 = vunpack.c.1.s8 %v638_v43  ;;  %v573_v55 = vunpack.c.3.s8 %v638_v43 }
  0x78   :  { %v137_v56 = vcvt.s32.f32 %v566_v41 }
  0x7d   :  { %v233_v62 = vpop.permute.xlu1 %232  ;;  %v223_v63 = vpop.permute.xlu0 %222 }
  0x7e   :  { %v377_v2 = vmul.f32 %v223_v63, %v121_v51  ;;  %v378_v3 = vmul.f32 %v223_v63, %v122_v52  ;;  %v381_v17 = vmul.f32 %v233_v62, %v125_v60  ;;  %v382_v18 = vmul.f32 %v233_v62, %v126_v61 }
  0x7f   :  { %v392_v60 = vmul.f32 %v785_v48, %v136_v33  ;;  %v139_v63 = vcvt.s32.f32 %v570_v49  ;;  %v578_v48 = vunpack.c.2.s8 %v639_v58 }
  0x80   :  { %v440_v11 = vadd.f32 %v377_v2, %v375_v0  ;;  %v477_v12 = vadd.f32 %v378_v3, %v376_v1  ;;  %v140_v0 = vcvt.s32.f32 %v571_v50  ;;  %v288_v3 = vpop.permute.xlu2 %287 }
  0x82   :  { %v441_v19 = vadd.f32 %v440_v11, %v379_v9  ;;  %v478_v20 = vadd.f32 %v477_v12, %v380_v10  ;;  %v141_v10 = vcvt.s32.f32 %v572_v54  ;;  %v142_v11 = vcvt.s32.f32 %v573_v55  ;;  %v640_v12 = vld [vmem:[%s851_s1 + $0x38] sm:$0xff]  }
  0x84   :  { %v442_v26 = vadd.f32 %v441_v19, %v381_v17  ;;  %v479_v27 = vadd.f32 %v478_v20, %v382_v18  ;;  %v143_v18 = vcvt.s32.f32 %v576_v6  ;;  %v144_v19 = vcvt.s32.f32 %v577_v7 }
  0x85   :  { %v253_v32 = vpop.permute.xlu1 %252  ;;  %v248_v35 = vpop.permute.xlu0 %247  ;;  %v582_v20 = vunpack.c.0.s8 %v640_v12  ;;  %v397_v24 = vmul.f32 %v793_v25, %v141_v10 }
  0x86   :  { %v443_v38 = vadd.f32 %v442_v26, %v383_v21  ;;  %v480_v39 = vadd.f32 %v479_v27, %v384_v22  ;;  %v387_v46 = vmul.f32 %v248_v35, %v131_v28  ;;  %v388_v47 = vmul.f32 %v248_v35, %v132_v29  ;;  %v641_v35 = vld [vmem:[%s851_s1 + $0x40] sm:$0xff]  }
  0x87   :  { %v389_v51 = vmul.f32 %v253_v32, %v133_v30  ;;  %v390_v52 = vmul.f32 %v253_v32, %v134_v31  ;;  %v583_v21 = vunpack.c.1.s8 %v640_v12  ;;  %v398_v26 = vmul.f32 %v793_v25, %v142_v11 }
  0x88   :  { %v444_v44 = vadd.f32 %v443_v38, %v385_v36  ;;  %v481_v45 = vadd.f32 %v480_v39, %v386_v37  ;;  %v145_v27 = vcvt.s32.f32 %v578_v48  ;;  %v146_v28 = vcvt.s32.f32 %v579_v13  ;;  %v303_v43 = vpop.permute.xlu2 %302 }
  0x89   :  { %v584_v31 = vunpack.c.2.s8 %v640_v12  ;;  %v585_v32 = vunpack.c.3.s8 %v640_v12  ;;  %v147_v40 = vcvt.s32.f32 %v582_v20  ;;  %v148_v33 = vcvt.s32.f32 %v583_v21 }
  0x8a   :  { %v445_v53 = vadd.f32 %v444_v44, %v387_v46  ;;  %v482_v34 = vadd.f32 %v481_v45, %v388_v47  ;;  %v588_v41 = vunpack.c.0.s8 %v641_v35  ;;  %v589_v42 = vunpack.c.1.s8 %v641_v35 }
  0x8b   :  { %v149_v50 = vcvt.s32.f32 %v584_v31  ;;  %v403_v54 = vmul.f32 %v288_v3, %v147_v40  ;;  %v404_v55 = vmul.f32 %v288_v3, %v148_v33 }
  0x8c   :  { %v446_v61 = vadd.f32 %v445_v53, %v389_v51  ;;  %v483_v62 = vadd.f32 %v482_v34, %v390_v52  ;;  %v150_v51 = vcvt.s32.f32 %v585_v32  ;;  %v642_v52 = vld [vmem:[%s851_s1 + $0x48] sm:$0xff]   ;;  %v590_v53 = vunpack.c.2.s8 %v641_v35 }
  0x8d   :  { %v268_v1 = vpop.permute.xlu1 %267  ;;  %v263_v2 = vpop.permute.xlu0 %262  ;;  %v591_v34 = vunpack.c.3.s8 %v641_v35  ;;  %v596_v6 = vunpack.c.2.s8 %v642_v52  ;;  %v597_v7 = vunpack.c.3.s8 %v642_v52 }
  0x8e   :  { %v447_v4 = vadd.f32 %v446_v61, %v391_v59  ;;  %v484_v5 = vadd.f32 %v483_v62, %v392_v60  ;;  %v393_v8 = vmul.f32 %v263_v2, %v137_v56  ;;  %v394_v9 = vmul.f32 %v263_v2, %v138_v57  ;;  %v643_v62 = vld [vmem:[%s851_s1 + $0x50] sm:$0xff]  }
  0x8f   :  { %v395_v14 = vmul.f32 %v268_v1, %v139_v63  ;;  %v396_v15 = vmul.f32 %v268_v1, %v140_v0  ;;  %v151_v56 = vcvt.s32.f32 %v588_v41  ;;  %v152_v57 = vcvt.s32.f32 %v589_v42 }
  0x90   :  { %v448_v16 = vadd.f32 %v447_v4, %v393_v8  ;;  %v485_v17 = vadd.f32 %v484_v5, %v394_v9  ;;  %v594_v60 = vunpack.c.0.s8 %v642_v52  ;;  %v595_v61 = vunpack.c.1.s8 %v642_v52  ;;  %v318_v48 = vpop.permute.xlu2 %317 }
  0x91   :  { %v153_v4 = vcvt.s32.f32 %v590_v53  ;;  %v154_v5 = vcvt.s32.f32 %v591_v34  ;;  %v600_v11 = vunpack.c.0.s8 %v643_v62  ;;  %v601_v12 = vunpack.c.1.s8 %v643_v62 }
  0x92   :  { %v449_v22 = vadd.f32 %v448_v16, %v395_v14  ;;  %v486_v23 = vadd.f32 %v485_v17, %v396_v15  ;;  %v155_v15 = vcvt.s32.f32 %v594_v60  ;;  %v156_v16 = vcvt.s32.f32 %v595_v61 }
  0x93   :  { %v409_v17 = vmul.f32 %v303_v43, %v153_v4  ;;  %v158_v20 = vcvt.s32.f32 %v597_v7  ;;  %v159_v21 = vcvt.s32.f32 %v600_v11 }
  0x94   :  { %v450_v36 = vadd.f32 %v449_v22, %v397_v24  ;;  %v487_v37 = vadd.f32 %v486_v23, %v398_v26  ;;  %v160_v22 = vcvt.s32.f32 %v601_v12  ;;  %v602_v26 = vunpack.c.2.s8 %v643_v62 }
  0x95   :  { %v283_v29 = vpop.permute.xlu1 %282  ;;  %v278_v30 = vpop.permute.xlu0 %277 }
  0x96   :  { %v399_v38 = vmul.f32 %v278_v30, %v143_v18  ;;  %v400_v39 = vmul.f32 %v278_v30, %v144_v19  ;;  %v401_v25 = vmul.f32 %v283_v29, %v145_v27  ;;  %v402_v44 = vmul.f32 %v283_v29, %v146_v28  ;;  %v644_v28 = vld [vmem:[%s851_s1 + $0x58] sm:$0xff]  }
  0x97   :  { %v410_v18 = vmul.f32 %v303_v43, %v154_v5  ;;  %v157_v19 = vcvt.s32.f32 %v596_v6  ;;  %v603_v27 = vunpack.c.3.s8 %v643_v62  ;;  %v606_v35 = vunpack.c.0.s8 %v644_v28 }
  0x98   :  { %v451_v45 = vadd.f32 %v450_v36, %v399_v38  ;;  %v488_v46 = vadd.f32 %v487_v37, %v400_v39  ;;  %v607_v36 = vunpack.c.1.s8 %v644_v28  ;;  %v18_v37 = vlaneseq  ;;  %v333_v52 = vpop.permute.xlu2 %332 }
  0x99   :  { %v163_v53 = vcvt.s32.f32 %v606_v35 }
  0x9a   :  { %v452_v47 = vadd.f32 %v451_v45, %v401_v25  ;;  %v489_v49 = vadd.f32 %v488_v46, %v402_v44  ;;  %vm822_vm0 = vcmp.lt.s32.totalorder %v18_v37, 256  ;;  %v161_v25 = vcvt.s32.f32 %v602_v26  ;;  %v645_v45 = vld [vmem:[%s851_s1 + $0x60] sm:$0xff]  }
  0x9b   :  { %v162_v44 = vcvt.s32.f32 %v603_v27  ;;  %v657_v46 = vmov 0.0   ;;  %v164_v34 = vcvt.s32.f32 %v607_v36 }
  0x9c   :  { %v453_v63 = vadd.f32 %v452_v47, %v403_v54  ;;  %v490_v0 = vadd.f32 %v489_v49, %v404_v55  ;;  %22 = vst.msk [vmem:[#allocation2] sm:$0x3] %vm822_vm0, %v657_v46  ;;  %v608_v47 = vunpack.c.2.s8 %v644_v28  ;;  %v609_v49 = vunpack.c.3.s8 %v644_v28 }
  0x9d   :  { %v298_v58 = vpop.permute.xlu1 %297  ;;  %v293_v59 = vpop.permute.xlu0 %292 }
  0x9e   :  { %v405_v1 = vmul.f32 %v293_v59, %v149_v50  ;;  %v406_v2 = vmul.f32 %v293_v59, %v150_v51  ;;  %v407_v8 = vmul.f32 %v298_v58, %v151_v56  ;;  %v408_v3 = vmul.f32 %v298_v58, %v152_v57 }
  0x9f   :  { %v415_v50 = vmul.f32 %v318_v48, %v159_v21  ;;  %v416_v51 = vmul.f32 %v318_v48, %v160_v22  ;;  %v612_v56 = vunpack.c.0.s8 %v645_v45  ;;  %v613_v57 = vunpack.c.1.s8 %v645_v45 }
  0xa0   :  { %v454_v9 = vadd.f32 %v453_v63, %v405_v1  ;;  %v491_v10 = vadd.f32 %v490_v0, %v406_v2  ;;  %v165_v62 = vcvt.s32.f32 %v608_v47  ;;  %v166_v63 = vcvt.s32.f32 %v609_v49  ;;  %v646_v2 = vld [vmem:[%s851_s1 + $0x68] sm:$0xff]   ;;  %v348_v28 = vpop.permute.xlu2 %347 }
  0xa1   :  { %v614_v0 = vunpack.c.2.s8 %v645_v45  ;;  %v615_v1 = vunpack.c.3.s8 %v645_v45  ;;  %v618_v11 = vunpack.c.0.s8 %v646_v2  ;;  %v619_v12 = vunpack.c.1.s8 %v646_v2 }
  0xa2   :  { %v455_v13 = vadd.f32 %v454_v9, %v407_v8  ;;  %v492_v14 = vadd.f32 %v491_v10, %v408_v3  ;;  %v167_v9 = vcvt.s32.f32 %v612_v56  ;;  %v168_v10 = vcvt.s32.f32 %v613_v57 }
  0xa3   :  { %v421_v48 = vmul.f32 %v333_v52, %v165_v62  ;;  %v171_v26 = vcvt.s32.f32 %v618_v11  ;;  %v172_v27 = vcvt.s32.f32 %v619_v12 }
  0xa4   :  { %v456_v29 = vadd.f32 %v455_v13, %v409_v17  ;;  %v493_v30 = vadd.f32 %v492_v14, %v410_v18  ;;  %v422_v13 = vmul.f32 %v333_v52, %v166_v63  ;;  %v169_v14 = vcvt.s32.f32 %v614_v0 }
  0xa5   :  { %v313_v23 = vpop.permute.xlu1 %312  ;;  %v308_v24 = vpop.permute.xlu0 %307  ;;  %v620_v18 = vunpack.c.2.s8 %v646_v2 }
  0xa6   :  { %v411_v31 = vmul.f32 %v308_v24, %v155_v15  ;;  %v412_v32 = vmul.f32 %v308_v24, %v156_v16  ;;  %v413_v38 = vmul.f32 %v313_v23, %v157_v19  ;;  %v414_v39 = vmul.f32 %v313_v23, %v158_v20  ;;  %v647_v20 = vld [vmem:[%s851_s1 + $0x70] sm:$0xff]  }
  0xa7   :  { %v170_v15 = vcvt.s32.f32 %v615_v1  ;;  %v621_v19 = vunpack.c.3.s8 %v646_v2 }
  0xa8   :  { %v457_v40 = vadd.f32 %v456_v29, %v411_v31  ;;  %v494_v33 = vadd.f32 %v493_v30, %v412_v32  ;;  %v624_v29 = vunpack.c.0.s8 %v647_v20  ;;  %v625_v30 = vunpack.c.1.s8 %v647_v20  ;;  %v363_v63 = vpop.permute.xlu2 %362 }
  0xaa   :  { %v458_v42 = vadd.f32 %v457_v40, %v413_v38  ;;  %v495_v43 = vadd.f32 %v494_v33, %v414_v39  ;;  %v173_v39 = vcvt.s32.f32 %v620_v18  ;;  %v174_v40 = vcvt.s32.f32 %v621_v19  ;;  %v648_v33 = vld [vmem:[%s851_s1 + $0x78] sm:$0xff]  }
  0xab   :  { %v175_v45 = vcvt.s32.f32 %v624_v29  ;;  %v176_v46 = vcvt.s32.f32 %v625_v30  ;;  %v632_v57 = vunpack.c.2.s8 %v648_v33 }
  0xac   :  { %v459_v58 = vadd.f32 %v458_v42, %v415_v50  ;;  %v496_v59 = vadd.f32 %v495_v43, %v416_v51  ;;  %v626_v42 = vunpack.c.2.s8 %v647_v20  ;;  %v627_v43 = vunpack.c.3.s8 %v647_v20 }
  0xad   :  { %v328_v54 = vpop.permute.xlu1 %327  ;;  %v323_v55 = vpop.permute.xlu0 %322  ;;  %v630_v50 = vunpack.c.0.s8 %v648_v33  ;;  %v631_v51 = vunpack.c.1.s8 %v648_v33 }
  0xae   :  { %v417_v60 = vmul.f32 %v323_v55, %v161_v25  ;;  %v418_v61 = vmul.f32 %v323_v55, %v162_v44  ;;  %v419_v4 = vmul.f32 %v328_v54, %v163_v53  ;;  %v420_v5 = vmul.f32 %v328_v54, %v164_v34 }
  0xaf   :  { %v427_v25 = vmul.f32 %v348_v28, %v171_v26  ;;  %v428_v44 = vmul.f32 %v348_v28, %v172_v27  ;;  %v177_v55 = vcvt.s32.f32 %v626_v42  ;;  %v178_v56 = vcvt.s32.f32 %v627_v43 }
  0xb0   :  { %v460_v6 = vadd.f32 %v459_v58, %v417_v60  ;;  %v497_v7 = vadd.f32 %v496_v59, %v418_v61  ;;  %v633_v58 = vunpack.c.3.s8 %v648_v33  ;;  %v179_v2 = vcvt.s32.f32 %v630_v50 }
  0xb2   :  { %v461_v8 = vadd.f32 %v460_v6, %v419_v4  ;;  %v498_v3 = vadd.f32 %v497_v7, %v420_v5  ;;  %v180_v4 = vcvt.s32.f32 %v631_v51  ;;  %v433_v5 = vmul.f32 %v363_v63, %v177_v55 }
  0xb3   :  { %v434_v6 = vmul.f32 %v363_v63, %v178_v56  ;;  %v181_v7 = vcvt.s32.f32 %v632_v57 }
  0xb4   :  { %v462_v21 = vadd.f32 %v461_v8, %v421_v48  ;;  %v499_v22 = vadd.f32 %v498_v3, %v422_v13  ;;  %v182_v8 = vcvt.s32.f32 %v633_v58 }
  0xb5   :  { %v343_v16 = vpop.permute.xlu1 %342  ;;  %v338_v17 = vpop.permute.xlu0 %337 }
  0xb6   :  { %v423_v23 = vmul.f32 %v338_v17, %v167_v9  ;;  %v424_v24 = vmul.f32 %v338_v17, %v168_v10  ;;  %v425_v31 = vmul.f32 %v343_v16, %v169_v14  ;;  %v426_v32 = vmul.f32 %v343_v16, %v170_v15 }
  0xb8   :  { %v463_v35 = vadd.f32 %v462_v21, %v423_v23  ;;  %v500_v36 = vadd.f32 %v499_v22, %v424_v24 }
  0xba   :  { %v464_v37 = vadd.f32 %v463_v35, %v425_v31  ;;  %v501_v38 = vadd.f32 %v500_v36, %v426_v32  ;;  %v439_v31 = vld [vmem:[#allocation2] sm:$0x3] }
  0xbc   :  { %v465_v52 = vadd.f32 %v464_v37, %v427_v25  ;;  %v502_v53 = vadd.f32 %v501_v38, %v428_v44  ;;  %v530_v38 = vld [vmem:[%s852_s2] sm:$0x3] }
  0xbd   :  { %v358_v47 = vpop.permute.xlu1 %357  ;;  %v353_v49 = vpop.permute.xlu0 %352 }
  0xbe   :  { %v429_v34 = vmul.f32 %v353_v49, %v173_v39  ;;  %v430_v54 = vmul.f32 %v353_v49, %v174_v40  ;;  %v431_v59 = vmul.f32 %v358_v47, %v175_v45  ;;  %v432_v60 = vmul.f32 %v358_v47, %v176_v46 }
  0xc0   :  { %v466_v61 = vadd.f32 %v465_v52, %v429_v34  ;;  %v503_v62 = vadd.f32 %v502_v53, %v430_v54 }
  0xc2   :  { %v467_v0 = vadd.f32 %v466_v61, %v431_v59  ;;  %v504_v1 = vadd.f32 %v503_v62, %v432_v60 }
  0xc4   :  { %v468_v10 = vadd.f32 %v467_v0, %v433_v5  ;;  %v505_v11 = vadd.f32 %v504_v1, %v434_v6 }
  0xc5   :  { %v373_v3 = vpop.permute.xlu1 %372  ;;  %v368_v9 = vpop.permute.xlu0 %367 }
  0xc6   :  { %v435_v12 = vmul.f32 %v368_v9, %v179_v2  ;;  %v436_v48 = vmul.f32 %v368_v9, %v180_v4  ;;  %v437_v13 = vmul.f32 %v373_v3, %v181_v7  ;;  %v438_v14 = vmul.f32 %v373_v3, %v182_v8 }
  0xc8   :  { %v469_v15 = vadd.f32 %v468_v10, %v435_v12  ;;  %v506_v16 = vadd.f32 %v505_v11, %v436_v48 }
  0xca   :  { %v470_v17 = vadd.f32 %v469_v15, %v437_v13  ;;  %v507_v18 = vadd.f32 %v506_v16, %v438_v14 }
  0xcc   :  { %v471_v19 = vrot.slane %v470_v17, 4  ;;  %v508_v20 = vrot.slane %v507_v18, 4 }
  0xce   :  { %v472_v21 = vadd.f32 %v471_v19, %v470_v17  ;;  %v509_v22 = vadd.f32 %v508_v20, %v507_v18 }
  0xd0   :  { %v473_v23 = vrot.slane %v472_v21, 2  ;;  %v510_v24 = vrot.slane %v509_v22, 2 }
  0xd2   :  { %v474_v26 = vadd.f32 %v473_v23, %v472_v21  ;;  %v511_v27 = vadd.f32 %v510_v24, %v509_v22 }
  0xd4   :  { %v475_v28 = vrot.slane %v474_v26, 1  ;;  %v512_v29 = vrot.slane %v511_v27, 1 }
  0xd6   :  { %v513_v30 = vadd.f32 %v512_v29, %v511_v27  ;;  %v476_v32 = vadd.f32 %v475_v28, %v474_v26 }
  0xd8   :  { %v516_v35 = vrot.slane %v513_v30, 7 }
  0xda   :  { %v518_v36 = vsel %vm517_vm1, %v476_v32, %v516_v35 }
  0xdb   :  { %v520_v37 = vadd.f32 %v518_v36, %v439_v31 }
  0xdd   :  { %525 = vst.msk [vmem:[#allocation2] sm:$0x3] %vm822_vm0, %v520_v37 }
  0xe4   :  { %v529_v39 = vld [vmem:[#allocation2] sm:$0x3] }
  0xe5   :  { %v531_v40 = vadd.f32 %v530_v38, %v529_v39 }
  0xe7   :  { %654 = vtanh.f32 %v531_v40 }
  0xed   :  { %v655_v33 = vpop.eup %654 }
  0xee   :  { %533 = vst.msk [vmem:[%s853_s3] sm:$0x3] %vm822_vm0, %v655_v33 }

// kernel: pool_unpool_graph.3
= control target key start
LH: loop header
LB: loop body
LE: loop exit
PB: predicated region body
PF: predicated region fallthrough
CT: control target
= control target key end

     0   :  { %s207_s21 = smov [#allocation3]   ;;  %s208_s22 = smov [#allocation4]   ;;  %s350_s0 = inlined_call_operand.vmem [shape: s32[8], index: 0, kind: input, shape index: {}]   ;;  %s351_s2 = inlined_call_operand.vmem [shape: f32[8,4], index: 2, kind: input, shape index: {}]   ;;  %s352_s3 = inlined_call_operand.vmem [shape: f32[8,4], index: 3, kind: output, shape index: {0}]   ;;  %s353_s4 = inlined_call_operand.vmem [shape: f32[8,4], index: 4, kind: output, shape index: {1}]   ;;  %s354_s1 = inlined_call_operand.vmem [shape: f32[8], index: 1, kind: input, shape index: {}]  }
   0x1   :  { %s11_s17 = sshll.u32 %s350_s0, 4  ;;  %s16_s20 = sshll.u32 %s354_s1, 4  ;;  %s12_s17 = int_to_ptr.vmem [resolvable:$true] %s11_s17  ;;  %s17_s20 = int_to_ptr.vmem [resolvable:$true] %s16_s20 }
   0x2   :  { %14 = dma.vmem_to_smem %s12_s17, 16, %s207_s21, [#allocation2] }
   0x3   :  { %19 = dma.vmem_to_smem %s17_s20, 16, %s208_s22, [#allocation2] }
   0x4   :  { %205 = dma.done.wait [#allocation2], 32 }
   0x5   :  { %206 = vsyncadd [#allocation2], 4294967264 }
   0x6   :  { %22 = sfence }
   0x7   :  { %v25_v0 = vlaneseq  ;;  %s27_s23 = sld [smem:[#allocation3]]  ;;  %vm138_vm8 = vcmask 31744  }
   0x8   :  { %s157_s24 = sld [smem:[#allocation3 + $0x1]] }
   0x9   :  { %v240_v1 = vshrl.u32 %v25_v0, 7  ;;  %s159_s25 = sld [smem:[#allocation3 + $0x2]] }
   0xa   :  { %s161_s0 = sld [smem:[#allocation3 + $0x3]] }
   0xb   :  { %s163_s26 = sld [smem:[#allocation3 + $0x4]]  ;;  %vm31_vm0 = vcmp.eq.s32.totalorder %v240_v1, 0  ;;  %vm45_vm1 = vcmp.eq.s32.totalorder %v240_v1, 1  ;;  %vm59_vm2 = vcmp.eq.s32.totalorder %v240_v1, 2  ;;  %vm73_vm3 = vcmp.eq.s32.totalorder %v240_v1, 3 }
   0xc   :  { %s165_s27 = sld [smem:[#allocation3 + $0x5]]  ;;  %vm87_vm4 = vcmp.eq.s32.totalorder %v240_v1, 4  ;;  %vm101_vm5 = vcmp.eq.s32.totalorder %v240_v1, 5  ;;  %vm115_vm6 = vcmp.eq.s32.totalorder %v240_v1, 6  ;;  %vm129_vm7 = vcmp.eq.s32.totalorder %v240_v1, 7 }
   0xd   :  { %s28_s29 = scalar_lea.vmem %s351_s2, %s27_s23  ;;  %s167_s30 = sld [smem:[#allocation3 + $0x6]] }
   0xe   :  { %v173_v2 = vld [vmem:[%s28_s29] ss:$0 sm:$0xff]  ;;  %s249_s7 = scalar_lea.vmem %s351_s2, %s157_s24  ;;  %s169_s8 = sld [smem:[#allocation3 + $0x7]] }
   0xf   :  { %v174_v3 = vld [vmem:[%s249_s7] ss:$0 sm:$0xff]  ;;  %s256_s11 = scalar_lea.vmem %s351_s2, %s159_s25  ;;  %s259_s12 = sld [smem:[#allocation4]]  ;;  %v35_v4 = vsel %vm31_vm0, %v173_v2, 0.0 }
  0x10   :  { %v175_v5 = vld [vmem:[%s256_s11] ss:$0 sm:$0xff]  ;;  %s267_s15 = scalar_lea.vmem %s351_s2, %s161_s0  ;;  %v49_v6 = vsel %vm45_vm1, %v174_v3, %v35_v4  ;;  %s279_s19 = sld [smem:[#allocation4 + $0x1]] }
  0x11   :  { %v176_v7 = vld [vmem:[%s267_s15] ss:$0 sm:$0xff]  ;;  %s276_s18 = scalar_lea.vmem %s351_s2, %s163_s26  ;;  %v63_v8 = vsel %vm59_vm2, %v175_v5, %v49_v6  ;;  %s291_s23 = sld [smem:[#allocation4 + $0x2]] }
  0x12   :  { %v177_v9 = vld [vmem:[%s276_s18] ss:$0 sm:$0xff]  ;;  %s287_s22 = scalar_lea.vmem %s351_s2, %s165_s27  ;;  %v77_v11 = vsel %vm73_vm3, %v176_v7, %v63_v8  ;;  %s299_s26 = sld [smem:[#allocation4 + $0x3]] }
  0x13   :  { %v29_v10 = vld [vmem:[%s28_s29] sm:$0x1]  ;;  %s112_s0 = scalar_lea.vmem %s351_s2, %s167_s30  ;;  %v91_v13 = vsel %vm87_vm4, %v177_v9, %v77_v11  ;;  %s164_s29 = sld [smem:[#allocation4 + $0x4]] }
  0x14   :  { %v178_v12 = vld [vmem:[%s287_s22] ss:$0 sm:$0xff]  ;;  %s306_s1 = scalar_lea.vmem %s351_s2, %s169_s8  ;;  %s166_s30 = sld [smem:[#allocation4 + $0x5]] }
  0x15   :  { %v179_v14 = vld [vmem:[%s112_s0] ss:$0 sm:$0xff]  ;;  %v105_v16 = vsel %vm101_vm5, %v178_v12, %v91_v13  ;;  %v36_v18 = vstv %s259_s12  ;;  %s168_s2 = sld [smem:[#allocation4 + $0x6]] }
  0x16   :  { %v43_v15 = vld [vmem:[%s249_s7] sm:$0x1]  ;;  %v119_v20 = vsel %vm115_vm6, %v179_v14, %v105_v16  ;;  %v37_v21 = vmul.f32 %v36_v18, %v29_v10  ;;  %v50_v24 = vstv %s279_s19  ;;  %s170_s5 = sld [smem:[#allocation4 + $0x7]] }
  0x17   :  { %v180_v17 = vld [vmem:[%s306_s1] ss:$0 sm:$0xff]  ;;  %v51_v27 = vmul.f32 %v50_v24, %v43_v15  ;;  %v64_v28 = vstv %s291_s23 }
  0x18   :  { %v57_v19 = vld [vmem:[%s256_s11] sm:$0x1]  ;;  %v133_v23 = vsel %vm129_vm7, %v180_v17, %v119_v20  ;;  %v38_v26 = vperm.slane %v37_v21, 0  ;;  %v78_v31 = vstv %s299_s26 }
  0x19   :  { %v71_v22 = vld [vmem:[%s267_s15] sm:$0x1]  ;;  %139 = vst.msk [vmem:[%s352_s3] sm:$0xff] %vm138_vm8, %v133_v23  ;;  %v65_v30 = vmul.f32 %v64_v28, %v57_v19  ;;  %v52_v34 = vperm.slane %v51_v27, 0  ;;  %v92_v36 = vstv %s164_s29 }
  0x1a   :  { %v85_v25 = vld [vmem:[%s276_s18] sm:$0x1]  ;;  %v39_v33 = vsel %vm31_vm0, %v38_v26, 0.0  ;;  %v79_v35 = vmul.f32 %v78_v31, %v71_v22  ;;  %v106_v40 = vstv %s166_s30 }
  0x1b   :  { %v99_v29 = vld [vmem:[%s287_s22] sm:$0x1]  ;;  %v66_v38 = vperm.slane %v65_v30, 0  ;;  %v93_v39 = vmul.f32 %v92_v36, %v85_v25  ;;  %v53_v41 = vsel %vm45_vm1, %v52_v34, %v39_v33  ;;  %v120_v44 = vstv %s168_s2 }
  0x1c   :  { %v113_v32 = vld [vmem:[%s112_s0] sm:$0x1]  ;;  %v80_v42 = vperm.slane %v79_v35, 0  ;;  %v107_v43 = vmul.f32 %v106_v40, %v99_v29  ;;  %v134_v48 = vstv %s170_s5 }
  0x1d   :  { %v127_v37 = vld [vmem:[%s306_s1] sm:$0x1]  ;;  %v67_v45 = vsel %vm59_vm2, %v66_v38, %v53_v41  ;;  %v94_v46 = vperm.slane %v93_v39, 0  ;;  %v121_v47 = vmul.f32 %v120_v44, %v113_v32 }
  0x1e   :  { %v81_v49 = vsel %vm73_vm3, %v80_v42, %v67_v45  ;;  %v108_v50 = vperm.slane %v107_v43, 0  ;;  %v135_v51 = vmul.f32 %v134_v48, %v127_v37 }
  0x1f   :  { %v95_v52 = vsel %vm87_vm4, %v94_v46, %v81_v49  ;;  %v122_v53 = vperm.slane %v121_v47, 0 }
  0x20   :  { %v109_v54 = vsel %vm101_vm5, %v108_v50, %v95_v52  ;;  %v136_v55 = vperm.slane %v135_v51, 0 }
  0x21   :  { %v123_v56 = vsel %vm115_vm6, %v122_v53, %v109_v54 }
  0x22   :  { %v137_v57 = vsel %vm129_vm7, %v136_v55, %v123_v56 }
  0x23   :  { %140 = vst.msk [vmem:[%s353_s4] sm:$0xff] %vm138_vm8, %v137_v57 }

</bundles_post_ra>
